<compile_context>
chip_gen: v7x
topology: tpu7x:2x2x1
jax: 0.10.0
libtpu: 0.0.40
codegen_flags: <defaults>
</compile_context>

<pallas_src>
import jax
import jax.numpy as jnp
from jax.experimental import pallas as pl
from jax.experimental.pallas import tpu as pltpu


def _round_up(x, m):
    return ((x + m - 1) // m) * m


def _backsub_kernel(bounds_ref, bounds_flip_ref, a_ref, out_ref):
    """One (out-column block, contraction block) step of the interval matmul.

    bounds_ref:      (2, TR)  rows = [lower_ext, upper_ext] chunk of the
                     extended input bounds (1.0 at the bias row, 0 in padding).
    bounds_flip_ref: (2, TR)  rows = [upper_ext, lower_ext] (pre-flipped in the
                     wrapper so the kernel needs no cross-sublane shuffles).
    a_ref:           (TR, TN) chunk of the padded abstract-bound matrix.
    out_ref:         (2, TN)  rows = [concrete_lower, concrete_upper];
                     accumulator resident across the contraction grid axis.
    """
    k = pl.program_id(1)

    @pl.when(k == 0)
    def _():
        out_ref[...] = jnp.zeros_like(out_ref)

    a = a_ref[...]                       # (TR, TN)
    pos = jnp.maximum(a, 0.0)
    neg = a - pos                        # == jnp.minimum(a, 0.0)

    # row 0: lower = lo@pos + hi@neg ; row 1: upper = hi@pos + lo@neg
    out_ref[...] += (
        jnp.dot(bounds_ref[...], pos, preferred_element_type=jnp.float32)
        + jnp.dot(bounds_flip_ref[...], neg, preferred_element_type=jnp.float32)
    )


def fully_connected_forward(inputs, weights, biases, in_lower, in_upper):
    """JAX/Pallas equivalent of FullyConnected.forward.

    Returns ((concrete_lower, concrete_upper), (abstract_lower, abstract_upper)).
    `inputs` is ignored, exactly like the torch forward (`_ = inputs`).
    """
    del inputs
    weights = jnp.asarray(weights, jnp.float32)       # (out_features, in_features)
    biases = jnp.asarray(biases, jnp.float32)         # (out_features,)
    in_lower = jnp.asarray(in_lower, jnp.float32)     # (in_features,)
    in_upper = jnp.asarray(in_upper, jnp.float32)     # (in_features,)

    n_out, n_in = weights.shape
    rows, cols = n_in + 1, n_out + 1

    # ---- abstract bounds: pure concatenation, assembled by XLA ----
    bounds = jnp.concatenate([weights.T, biases[None, :]], axis=0)     # (rows, n_out)
    pad_col = jnp.zeros((rows, 1), jnp.float32).at[-1, 0].set(1.0)
    abstract = jnp.concatenate([bounds, pad_col], axis=1)              # (rows, cols)

    # ---- (8,128)-aligned padded operands for the Pallas interval matmul ----
    rp8 = _round_up(rows, 8)
    tr = rp8 if rp8 <= 512 else 512          # contraction block (mult. of 8/128)
    rp = _round_up(rp8, tr)
    cp128 = _round_up(cols, 128)
    tn = cp128 if cp128 <= 512 else 512      # lane-dense output block
    cp = _round_up(cp128, tn)

    a_pad = jnp.pad(abstract, ((0, rp - rows), (0, cp - cols)))        # (rp, cp)

    # Extended input bounds: concrete bounds for the n_in real inputs, 1.0 at
    # the bias row (so the bias flows through the matmul), 0 in the padding.
    lo_ext = jnp.zeros((rp,), jnp.float32).at[:n_in].set(in_lower).at[n_in].set(1.0)
    hi_ext = jnp.zeros((rp,), jnp.float32).at[:n_in].set(in_upper).at[n_in].set(1.0)
    bounds_ext = jnp.stack([lo_ext, hi_ext], axis=0)                   # (2, rp)
    bounds_flip = jnp.stack([hi_ext, lo_ext], axis=0)                  # (2, rp)

    grid = (cp // tn, rp // tr)   # (output-column blocks, contraction blocks)
    conc = pl.pallas_call(
        _backsub_kernel,
        out_shape=jax.ShapeDtypeStruct((2, cp), jnp.float32),
        grid=grid,
        in_specs=[
            pl.BlockSpec((2, tr), lambda j, k: (0, k)),
            pl.BlockSpec((2, tr), lambda j, k: (0, k)),
            pl.BlockSpec((tr, tn), lambda j, k: (k, j)),
        ],
        out_specs=pl.BlockSpec((2, tn), lambda j, k: (0, j)),
        compiler_params=pltpu.CompilerParams(
            dimension_semantics=("parallel", "arbitrary")),
    )(bounds_ext, bounds_flip, a_pad)

    concrete_lower = conc[0, :n_out]
    concrete_upper = conc[1, :n_out]

    # torch returns the *same* tensor object for lower and upper abstract bounds.
    return (concrete_lower, concrete_upper), (abstract, abstract)


if __name__ == "__main__":
    key = jax.random.PRNGKey(0)
    k_w, k_b, k_x, k_in = jax.random.split(key, 4)

    in_features, out_features = 64, 32
    weights = jax.random.normal(k_w, (out_features, in_features), jnp.float32) * 0.1
    biases = jax.random.normal(k_b, (out_features,), jnp.float32) * 0.1
    inputs = jax.random.uniform(k_x, (2, in_features), jnp.float32)    # ignored by forward
    x0 = jax.random.uniform(k_in, (in_features,), jnp.float32)
    eps = 0.1
    in_lower, in_upper = x0 - eps, x0 + eps

    (c_lo, c_hi), (a_lo, a_hi) = fully_connected_forward(
        inputs, weights, biases, in_lower, in_upper)
    jax.block_until_ready((c_lo, c_hi, a_lo, a_hi))

    # Plain-JAX reference (same semantics as the torch module with a
    # single-hop back-substitution against the input interval).
    rows, cols = in_features + 1, out_features + 1
    ref_bounds = jnp.concatenate([weights.T, biases[None, :]], axis=0)
    ref_pad = jnp.zeros((rows, 1), jnp.float32).at[-1, 0].set(1.0)
    ref_abstract = jnp.concatenate([ref_bounds, ref_pad], axis=1)
    w_pos = jnp.maximum(weights, 0.0)
    w_neg = jnp.minimum(weights, 0.0)
    ref_lo = w_pos @ in_lower + w_neg @ in_upper + biases
    ref_hi = w_pos @ in_upper + w_neg @ in_lower + biases

    assert a_lo.shape == (rows, cols) and a_hi.shape == (rows, cols)
    assert c_lo.shape == (out_features,) and c_hi.shape == (out_features,)
    assert jnp.allclose(a_lo, ref_abstract, atol=1e-6)
    assert jnp.allclose(a_hi, ref_abstract, atol=1e-6)
    assert jnp.allclose(c_lo, ref_lo, atol=1e-4, rtol=1e-4)
    assert jnp.allclose(c_hi, ref_hi, atol=1e-4, rtol=1e-4)
    assert bool(jnp.all(c_lo <= c_hi + 1e-5))

    print("KERNEL_OK")
</pallas_src>

<mosaic_0001>
module attributes {stable_mosaic.version = 11 : i64} {
  func.func @_backsub_kernel(%arg0: i32, %arg1: i32, %arg2: memref<2x72xf32, #tpu.memory_space<vmem>>, %arg3: memref<2x72xf32, #tpu.memory_space<vmem>>, %arg4: memref<72x128xf32, #tpu.memory_space<vmem>>, %arg5: memref<2x128xf32, #tpu.memory_space<vmem>>) attributes {dimension_semantics = [#tpu.dimension_semantics<parallel>, #tpu.dimension_semantics<arbitrary>], iteration_bounds = array<i64: 1, 1>, scalar_prefetch = 0 : i64, scratch_operands = 0 : i64, tpu.core_type = #tpu.core_type<tc>, window_params = [{transform_indices = @transform_0, window_bounds = array<i64: 2, 72>}, {transform_indices = @transform_1, window_bounds = array<i64: 2, 72>}, {transform_indices = @transform_2, window_bounds = array<i64: 72, 128>}, {transform_indices = @transform_3, window_bounds = array<i64: 2, 128>}]} {
    %c0_i32 = arith.constant 0 : i32
    %0 = arith.cmpi eq, %arg1, %c0_i32 : i32
    %1 = arith.extui %0 : i1 to i32
    %c0_i32_0 = arith.constant 0 : i32
    %2 = arith.cmpi ne, %1, %c0_i32_0 : i32
    scf.if %2 {
      %cst_12 = arith.constant 0.000000e+00 : f32
      %15 = vector.broadcast %cst_12 : f32 to vector<2x128xf32>
      %c0_13 = arith.constant 0 : index
      %c0_14 = arith.constant 0 : index
      %16 = vector.load %arg5[%c0_13, %c0_14] : memref<2x128xf32, #tpu.memory_space<vmem>>, vector<2x128xf32>
      tpu.vector_store %arg5[%c0_13, %c0_14], %15 {strides = array<i32>} : memref<2x128xf32, #tpu.memory_space<vmem>>, vector<2x128xf32>,
    } else {
    }
    %c0 = arith.constant 0 : index
    %c0_1 = arith.constant 0 : index
    %3 = vector.load %arg4[%c0, %c0_1] : memref<72x128xf32, #tpu.memory_space<vmem>>, vector<72x128xf32>
    %cst = arith.constant 0.000000e+00 : f32
    %4 = vector.broadcast %cst : f32 to vector<72x128xf32>
    %5 = arith.maximumf %3, %4 : vector<72x128xf32>
    %6 = arith.subf %3, %5 : vector<72x128xf32>
    %c0_2 = arith.constant 0 : index
    %c0_3 = arith.constant 0 : index
    %7 = vector.load %arg5[%c0_2, %c0_3] : memref<2x128xf32, #tpu.memory_space<vmem>>, vector<2x128xf32>
    %c0_4 = arith.constant 0 : index
    %c0_5 = arith.constant 0 : index
    %8 = vector.load %arg2[%c0_4, %c0_5] : memref<2x72xf32, #tpu.memory_space<vmem>>, vector<2x72xf32>
    %cst_6 = arith.constant dense<0.000000e+00> : vector<2x128xf32>
    %9 = tpu.matmul %8, %5, %cst_6 {dimension_numbers = #tpu.dot_dimension_numbers<[1], [0], [0], [1], [0, 0, 1, 1], [], []>} : vector<2x72xf32>, vector<72x128xf32>, vector<2x128xf32> -> vector<2x128xf32>
    %c0_7 = arith.constant 0 : index
    %c0_8 = arith.constant 0 : index
    %10 = vector.load %arg3[%c0_7, %c0_8] : memref<2x72xf32, #tpu.memory_space<vmem>>, vector<2x72xf32>
    %cst_9 = arith.constant dense<0.000000e+00> : vector<2x128xf32>
    %11 = tpu.matmul %10, %6, %cst_9 {dimension_numbers = #tpu.dot_dimension_numbers<[1], [0], [0], [1], [0, 0, 1, 1], [], []>} : vector<2x72xf32>, vector<72x128xf32>, vector<2x128xf32> -> vector<2x128xf32>
    %12 = arith.addf %9, %11 : vector<2x128xf32>
    %13 = arith.addf %7, %12 : vector<2x128xf32>
    %c0_10 = arith.constant 0 : index
    %c0_11 = arith.constant 0 : index
    %14 = vector.load %arg5[%c0_10, %c0_11] : memref<2x128xf32, #tpu.memory_space<vmem>>, vector<2x128xf32>
    tpu.vector_store %arg5[%c0_10, %c0_11], %13 {strides = array<i32>} : memref<2x128xf32, #tpu.memory_space<vmem>>, vector<2x128xf32>,
    return
  }
  func.func @transform_0(%arg0: i32, %arg1: i32) -> (i32, i32) {
    %c0_i32 = arith.constant 0 : i32
    %c0_i32_0 = arith.constant 0 : i32
    return %c0_i32, %arg1 : i32, i32
  }
  func.func @transform_1(%arg0: i32, %arg1: i32) -> (i32, i32) {
    %c0_i32 = arith.constant 0 : i32
    %c0_i32_0 = arith.constant 0 : i32
    return %c0_i32, %arg1 : i32, i32
  }
  func.func @transform_2(%arg0: i32, %arg1: i32) -> (i32, i32) {
    %c0_i32 = arith.constant 0 : i32
    return %arg1, %arg0 : i32, i32
  }
  func.func @transform_3(%arg0: i32, %arg1: i32) -> (i32, i32) {
    %c0_i32 = arith.constant 0 : i32
    %c0_i32_0 = arith.constant 0 : i32
    return %c0_i32, %arg0 : i32, i32
  }
}

</mosaic_0001>

<bundles_post_ra>
// kernel: tpu_custom_call.1
= control target key start
LH: loop header
LB: loop body
LE: loop exit
PB: predicated region body
PF: predicated region fallthrough
CT: control target
= control target key end

     0   :  { %8 = vsyncpa [#allocation3], 0  ;;  %s483_s0 = inlined_call_operand.hbm [shape: f32[2,72], index: 0, kind: input, shape index: {}]   ;;  %s484_s1 = inlined_call_operand.vmem [shape: f32[2,72], index: 1, kind: input, shape index: {}]   ;;  %s485_s2 = inlined_call_operand.hbm [shape: f32[72,128], index: 2, kind: input, shape index: {}]   ;;  %s486_s3 = inlined_call_operand.hbm [shape: f32[2,128], index: 3, kind: output, shape index: {}]  }
   0x1   :  { %9 = vsyncpa [#allocation6], 0 }
   0x2   :  { %10 = vsyncpa [#allocation4], 0  ;;  %s409_s12 = smov [#allocation2]   ;;  %s410_s14 = smov [#allocation5]  }
   0x3   :  { %s17_s13 = sshll.u32 %s409_s12, 4  ;;  %s28_s15 = sshll.u32 %s410_s14, 4  ;;  %s18_s13 = int_to_ptr.vmem [resolvable:$true] %s17_s13  ;;  %s437_s15 = int_to_ptr.vmem [resolvable:$true] %s28_s15 }
   0x4   :  { %s337_s18 = scalar_lea.hbm %s483_s0, 32 }
   0x5   :  { %p338_p0 = scmp.ne.s32.totalorder %s483_s0, %s337_s18  ;;  %p341_p1 = scmp.lt.u32.totalorder %s337_s18, %s483_s0 }
   0x7   :  { %p343_p2 = pnand %p341_p1, %p338_p0 }
   0x9   :  { %346 = shalt.err (!%p343_p2)
}
   0xa   :  { %s347_s23 = scalar_lea.vmem %s18_s13, 32  ;;  %p352_p4 = scmp.lt.s32.totalorder %s18_s13, %s18_s13 }
   0xb   :  { %p348_p3 = scmp.ne.s32.totalorder %s18_s13, %s347_s23  ;;  %p353_p5 = scmp.lt.s32.totalorder %s347_s23, %s347_s23 }
   0xd   :  { %p354_p6 = por %p353_p5, %p352_p4 }
   0xf   :  { %p355_p7 = pnand %p354_p6, %p348_p3 }
  0x11   :  { %358 = shalt.err (!%p355_p7)
}
  0x12   :  { %20 = dma.hbm_to_vmem [thread:$0]  %s483_s0, 32, %s18_s13, [#allocation3]  }
  0x13   :  { %s359_s28 = scalar_lea.hbm %s485_s2, 1152 }
  0x14   :  { %p360_p8 = scmp.ne.s32.totalorder %s485_s2, %s359_s28  ;;  %p363_p9 = scmp.lt.u32.totalorder %s359_s28, %s485_s2 }
  0x16   :  { %p365_p10 = pnand %p363_p9, %p360_p8 }
  0x18   :  { %368 = shalt.err (!%p365_p10)
}
  0x19   :  { %s369_s6 = scalar_lea.vmem %s437_s15, 1152  ;;  %p374_p12 = scmp.lt.s32.totalorder %s437_s15, %s437_s15 }
  0x1a   :  { %p370_p11 = scmp.ne.s32.totalorder %s437_s15, %s369_s6  ;;  %p375_p13 = scmp.lt.s32.totalorder %s369_s6, %s369_s6 }
  0x1c   :  { %p376_p0 = por %p375_p13, %p374_p12 }
  0x1e   :  { %p377_p1 = pnand %p376_p0, %p370_p11 }
  0x20   :  { %380 = shalt.err (!%p377_p1)
}
  0x21   :  { %s411_s0 = smov 128   ;;  %s412_s7 = smov 8  }
  0x22   :  { %34 = dma.hbm_to_vmem [thread:$0]  %s485_s2, 1152, %s437_s15, [#allocation6], %s411_s0, %s411_s0, %s412_s7  }
  0x23   :  { %403 = dma.done.wait [#allocation3], 32  }
  0x24   :  { %404 = vsyncadd [#allocation3], 4294967264 }
  0x25   :  { %405 = dma.done.wait [#allocation6], 1152  }
  0x26   :  { %406 = vsyncadd [#allocation6], 4294966144  ;;  %v413_v0 = vmov 0.0|0.0   ;;  %v414_v1 = vmov 0.0   ;;  %vm415_vm0 = vmmov 0   ;;  %v46_v2 = vld [vmem:[#allocation5] sm:$0xff] }
  0x27   :  { %317 = vmatprep.subr.bf16.mxu1 %v413_v0  ;;  %305 = vmatprep.subr.bf16.mxu0 %v413_v0  ;;  %45 = vst [vmem:[#allocation7] sm:$0x3] %v414_v1  ;;  %v47_v3 = vld [vmem:[#allocation5 + $0x8] sm:$0xff]  ;;  %v48_v4 = vld [vmem:[#allocation5 + $0x10] sm:$0xff]  ;;  %v55_v5 = vmax.f32 %v46_v2, 0.0  ;;  %v49_v7 = vld [vmem:[#allocation5 + $0x18] sm:$0xff] }
  0x28   :  { %302 = vmatprep.mubr.msk.f32.mxu1 %vm415_vm0, %v414_v1  ;;  %281 = vmatprep.mubr.msk.f32.mxu0 %vm415_vm0, %v414_v1  ;;  %v56_v6 = vmax.f32 %v47_v3, 0.0  ;;  %v57_v8 = vmax.f32 %v48_v4, 0.0  ;;  %v50_v9 = vld [vmem:[#allocation5 + $0x20] sm:$0xff]  ;;  %v51_v10 = vld [vmem:[#allocation5 + $0x28] sm:$0xff]  ;;  %v58_v11 = vmax.f32 %v49_v7, 0.0  ;;  %v52_v19 = vld [vmem:[#allocation5 + $0x30] sm:$0xff] }
  0x29   :  { %v59_v12 = vmax.f32 %v50_v9, 0.0  ;;  %v60_v13 = vmax.f32 %v51_v10, 0.0  ;;  %v64_v15 = vsub.f32 %v46_v2, %v55_v5  ;;  %v53_v20 = vld [vmem:[#allocation5 + $0x38] sm:$0xff]  ;;  %v61_v26 = vmax.f32 %v52_v19, 0.0  ;;  %v54_v32 = vld [vmem:[#allocation5 + $0x40] sm:$0xff]  ;;  %s416_s11 = smov [#allocation7]  }
  0x2a   :  { %v318_v14 = vpack.c.bf16 %v56_v6, %v55_v5  ;;  %v65_v16 = vsub.f32 %v47_v3, %v56_v6  ;;  %v66_v17 = vsub.f32 %v48_v4, %v57_v8  ;;  %v67_v18 = vsub.f32 %v49_v7, %v58_v11  ;;  %v74_v37 = vld [vmem:[#allocation2] sm:$0x3]  ;;  %s231_s12 = sshll.u32 %s416_s11, 4  ;;  %s232_s12 = int_to_ptr.vmem [resolvable:$true] %s231_s12 }
  0x2b   :  { %v321_v22 = vpack.c.bf16 %v58_v11, %v57_v8  ;;  %v68_v23 = vsub.f32 %v50_v9, %v59_v12  ;;  %v69_v25 = vsub.f32 %v51_v10, %v60_v13  ;;  %v62_v27 = vmax.f32 %v53_v20, 0.0  ;;  %v75_v38 = vld [vmem:[%s484_s1] sm:$0x3]  ;;  %s381_s13 = scalar_lea.vmem %s232_s12, 32  ;;  %p386_p3 = scmp.lt.s32.totalorder %s232_s12, %s232_s12 }
  0x2c   :  { %319 = vmatpush3.bf16.msra.mxu1 %v318_v14  ;;  %v306_v21 = vpack.c.bf16 %v65_v16, %v64_v15  ;;  %v309_v24 = vpack.c.bf16 %v67_v18, %v66_v17  ;;  %v324_v28 = vpack.c.bf16 %v60_v13, %v59_v12  ;;  %v70_v30 = vsub.f32 %v52_v19, %v61_v26  ;;  %p382_p2 = scmp.ne.s32.totalorder %s232_s12, %s381_s13  ;;  %p387_p4 = scmp.lt.s32.totalorder %s381_s13, %s381_s13 }
  0x2d   :  { %320 = vmatprep.subr.bf16.mxu1 %v413_v0  ;;  %v312_v29 = vpack.c.bf16 %v69_v25, %v68_v23  ;;  %v71_v31 = vsub.f32 %v53_v20, %v62_v27  ;;  %v327_v33 = vpack.c.bf16 %v62_v27, %v61_v26  ;;  %v63_v35 = vmax.f32 %v54_v32, 0.0 }
  0x2e   :  { %307 = vmatpush3.bf16.msra.mxu0 %v306_v21  ;;  %vm76_vm1 = vcmask 588800   ;;  %v73_v41 = vld [vmem:[#allocation7] sm:$0x3]  ;;  %p388_p5 = por %p387_p4, %p386_p3 }
  0x2f   :  { %308 = vmatprep.subr.bf16.mxu0 %v413_v0  ;;  %v315_v34 = vpack.c.bf16 %v71_v31, %v70_v30  ;;  %v72_v36 = vsub.f32 %v54_v32, %v63_v35 }
  0x30   :  { %322 = vmatpush3.bf16.msra.mxu1 %v321_v22  ;;  %p389_p6 = pnand %p388_p5, %p382_p2 }
  0x31   :  { %323 = vmatprep.subr.bf16.mxu1 %v413_v0 }
  0x32   :  { %310 = vmatpush3.bf16.msra.mxu0 %v309_v24 }
  0x33   :  { %311 = vmatprep.subr.bf16.mxu0 %v413_v0 }
  0x34   :  { %325 = vmatpush3.bf16.msra.mxu1 %v324_v28 }
  0x35   :  { %326 = vmatprep.subr.bf16.mxu1 %v413_v0 }
  0x36   :  { %313 = vmatpush3.bf16.msra.mxu0 %v312_v29 }
  0x37   :  { %314 = vmatprep.subr.bf16.mxu0 %v413_v0 }
  0x38   :  { %328 = vmatpush3.bf16.msra.mxu1 %v327_v33 }
  0x39   :  { %300 = vmatprep.subr.mxu1 %v414_v1 }
  0x3a   :  { %316 = vmatpush3.bf16.msra.mxu0 %v315_v34 }
  0x3b   :  { %279 = vmatprep.subr.mxu0 %v414_v1 }
  0x3c   :  { %301 = vmatpush3.msra.mxu1 %v63_v35 }
  0x3d   :  { %303 = vmatmul.mubr.msk.f32.vlgmr.msra.gmra.mrb[0].mxu1 %vm76_vm1, %v74_v37 }
  0x3e   :  { %280 = vmatpush3.msra.mxu0 %v72_v36 }
  0x3f   :  { %282 = vmatmul.mubr.msk.f32.vlgmr.msra.gmra.mrb[0].mxu0 %vm76_vm1, %v75_v38 }
 0x110   :  { %v219_v39 = vpop.f32.mrb[0].mxu1 }
 0x111   :  { %v304_v40 = vpop.f32.mrb[1].mxu1 }
 0x112   :  { %v146_v42 = vpop.f32.mrb[0].mxu0 }
 0x113   :  { %v220_v43 = vadd.f32 %v219_v39, %v146_v42  ;;  %v283_v44 = vpop.f32.mrb[1].mxu0 }
 0x115   :  { %v223_v45 = vadd.f32 %v220_v43, %v73_v41 }
 0x117   :  { %224 = vst [vmem:[#allocation7] sm:$0x3] %v223_v45 }
 0x118   :  { %392 = shalt.err (!%p389_p6)
}
 0x119   :  { %s393_s15 = scalar_lea.hbm %s486_s3, 32 }
 0x11a   :  { %p394_p7 = scmp.ne.s32.totalorder %s486_s3, %s393_s15  ;;  %p397_p8 = scmp.lt.u32.totalorder %s393_s15, %s486_s3 }
 0x11c   :  { %p399_p9 = pnand %p397_p8, %p394_p7 }
 0x11e   :  { %402 = shalt.err (!%p399_p9)
}
 0x11f   :  { %234 = dma.vmem_to_hbm [thread:$0]  %s232_s12, 32, %s486_s3, [#allocation4]  }
 0x120   :  { %407 = dma.done.wait [#allocation4], 32  }
 0x121   :  { %408 = vsyncadd [#allocation4], 4294967264 }
 0x122   :  { %238 = vsyncpa [#allocation3], 1 }
 0x123   :  { %239 = vsyncpa [#allocation6], 1 }
 0x124   :  { %240 = vsyncpa [#allocation4], 1 }

</bundles_post_ra>
